<compile_context>
chip_gen: v7x
topology: tpu7x:2x2x1
jax: 0.10.0
libtpu: 0.0.40
codegen_flags: <defaults>
</compile_context>

<pallas_src>
import numpy as np

import jax
import jax.numpy as jnp
from jax.experimental import pallas as pl
from jax.experimental.pallas import tpu as pltpu


def _round_up(x, m):
    return -(-x // m) * m


# ----------------------------- Pallas kernel -------------------------------

def _fused_net_kernel(x_ref, w1_ref, b1_ref, w2_ref, b2_ref,
                      w3_ref, b3_ref, w4_ref, b4_ref, o_ref):
    """Entire forward pass for one block of batch rows, fully VMEM-resident."""
    cdt = w1_ref.dtype                      # bf16 compute, f32 accumulate
    # BN + pad + cv1 (folded into w1/b1) + ReLU
    a = jnp.dot(x_ref[...].astype(cdt), w1_ref[...],
                preferred_element_type=jnp.float32)
    a = jnp.maximum(a + b1_ref[...], 0.0)
    # ss1 + cv2 collapsed to block-diagonal 1x1 conv + ReLU
    a = jnp.dot(a.astype(cdt), w2_ref[...], preferred_element_type=jnp.float32)
    a = jnp.maximum(a + b2_ref[...], 0.0)
    # ss2 + maxpool + ToDense + flatten + dropout1(eval) absorbed in w3 row-gather; fc1 + ReLU
    a = jnp.dot(a.astype(cdt), w3_ref[...], preferred_element_type=jnp.float32)
    a = jnp.maximum(a + b3_ref[...], 0.0)
    # dropout2(eval) + fc2 + log_softmax
    z = jnp.dot(a.astype(cdt), w4_ref[...],
                preferred_element_type=jnp.float32) + b4_ref[...]
    z = z - jnp.max(z, axis=-1, keepdims=True)
    o_ref[...] = (z - jnp.log(jnp.sum(jnp.exp(z), axis=-1, keepdims=True))
                  ).astype(o_ref.dtype)


def fused_forward(x_flat, w1, b1, w2, b2, w3, b3, w4, b4, *, block_m=512):
    """out = log_softmax(fc2(relu(fc1(relu(cv2(relu(cv1(bn(x))))))))) in one pallas_call.

    Grid is over batch rows only (weights stay VMEM-resident); the axis is marked
    "parallel". tm is a multiple of 8, capped at block_m, and chosen so the grid has
    >= 2 steps whenever B allows it (so both TensorCores are used on v7x). The batch
    is zero-padded to a multiple of tm so every grid step is identical (no ragged
    masked stores, no garbage rows through exp/log). The final (B, 10) store is the
    only lane-sparse write left; padding it to 128 lanes would cost an extra XLA
    slice op, which is more than one tiny masked store.
    """
    B, K = x_flat.shape
    N = w4.shape[1]

    tm = min(block_m, max(8, _round_up(-(-B // 2), 8)))
    B_pad = _round_up(B, tm)
    if B_pad != B:
        x_flat = jnp.pad(x_flat, ((0, B_pad - B), (0, 0)))
    grid = (B_pad // tm,)

    weight_bytes = sum(int(np.prod(a.shape)) * a.dtype.itemsize
                       for a in (w1, b1, w2, b2, w3, b3, w4, b4))
    cost = pl.CostEstimate(
        flops=2 * B_pad * (K * w1.shape[1] + w2.shape[0] * w2.shape[1]
                           + w3.shape[0] * w3.shape[1] + w4.shape[0] * N),
        transcendentals=B_pad * (N + 1),
        bytes_accessed=(B_pad * K * x_flat.dtype.itemsize
                        + B_pad * N * 4 + weight_bytes))

    const = lambda i: (0, 0)
    out = pl.pallas_call(
        _fused_net_kernel,
        out_shape=jax.ShapeDtypeStruct((B_pad, N), jnp.float32),
        grid=grid,
        in_specs=[pl.BlockSpec((tm, K), lambda i: (i, 0)),
                  pl.BlockSpec(tuple(w1.shape), const),
                  pl.BlockSpec(tuple(b1.shape), const),
                  pl.BlockSpec(tuple(w2.shape), const),
                  pl.BlockSpec(tuple(b2.shape), const),
                  pl.BlockSpec(tuple(w3.shape), const),
                  pl.BlockSpec(tuple(b3.shape), const),
                  pl.BlockSpec(tuple(w4.shape), const),
                  pl.BlockSpec(tuple(b4.shape), const)],
        out_specs=pl.BlockSpec((tm, N), lambda i: (i, 0)),
        compiler_params=pltpu.CompilerParams(
            dimension_semantics=("parallel",),
            vmem_limit_bytes=48 * 1024 * 1024),
        cost_estimate=cost,
    )(x_flat, w1, b1, w2, b2, w3, b3, w4, b4)
    return out[:B] if B_pad != B else out


# ----------------------- trace-time weight folding --------------------------

def fold_params(params, *, H, W, pad=1, k=5, stride=5, scale2=5, pool=2,
                compute_dtype=jnp.bfloat16):
    """Fold BN / zero-pad / sparse-scale / max-pool / flatten into 4 dense layers.

    All index bookkeeping is static numpy; only parameter-sized jnp ops run per call.
    The 108-wide hidden dimension is zero-padded to 128 so stages 2-4 are fully
    lane-aligned; weights are returned in `compute_dtype` (bf16), biases stay f32.
    """
    cv1_w, cv1_b = params["cv1_w"], params["cv1_b"]
    cv2_w, cv2_b = params["cv2_w"], params["cv2_b"]
    bn_scale, bn_shift = params["bn_scale"], params["bn_shift"]
    fc1_w, fc1_b = params["fc1_w"], params["fc1_b"]
    fc2_w, fc2_b = params["fc2_w"], params["fc2_b"]

    kk, _, Cin, C1 = cv1_w.shape
    assert kk == k and stride == k
    Hp, Wp = H + 2 * pad, W + 2 * pad
    ho, wo = (Hp - k) // stride + 1, (Wp - k) // stride + 1
    S = ho * wo
    C2 = cv2_w.shape[3]
    P1 = max(128, _round_up(S * C1, 128))   # lane-padded width after stage 1
    P2 = max(128, _round_up(S * C2, 128))   # lane-padded width after stage 2

    # ---- stage 1: BN affine + zero-pad + cv1 (non-overlapping patches).
    si, sj, kh, kw, ci = np.meshgrid(np.arange(ho), np.arange(wo),
                                     np.arange(k), np.arange(k), np.arange(Cin),
                                     indexing="ij")
    r = stride * si + kh - pad          # real (unpadded) row of this tap
    c = stride * sj + kw - pad
    si, sj, kh, kw, ci = (a.reshape(-1) for a in (si, sj, kh, kw, ci))
    r, c = r.reshape(-1), c.reshape(-1)
    valid = (r >= 0) & (r < H) & (c >= 0) & (c < W)        # padded taps contribute 0
    site = si * wo + sj
    rows = np.where(valid, ci * H * W + r * W + c, 0).astype(np.int32)   # NCHW flat idx
    cols = (site[:, None] * C1 + np.arange(C1)[None, :]).astype(np.int32)

    w_taps = cv1_w[kh, kw, ci, :]                                        # (S*k*k*Cin, C1)
    vmask = jnp.asarray(valid)[:, None]
    w_vals = jnp.where(vmask, bn_scale[ci][:, None] * w_taps, 0.0)
    w1 = jnp.zeros((Cin * H * W, S * C1), jnp.float32)
    w1 = w1.at[rows[:, None], cols].add(w_vals)
    w1 = jnp.pad(w1, ((0, 0), (0, P1 - S * C1)))                         # lane-pad to 128
    # BN shift only acts on active (real) positions -> per-site bias, exact at border.
    shift_vals = jnp.where(vmask, bn_shift[ci][:, None] * w_taps, 0.0)
    b1 = (jnp.zeros((S, C1), jnp.float32).at[site].add(shift_vals)
          + cv1_b[None, :]).reshape(1, S * C1)
    b1 = jnp.pad(b1, ((0, 0), (0, P1 - S * C1)))

    # ---- stage 2: ss1 + cv2 -> per-site 1x1 conv (block-diagonal), ss2 deferred.
    w2 = jnp.kron(jnp.eye(S, dtype=jnp.float32), cv2_w[0, 0])           # (S*C1, S*C2)
    w2 = jnp.pad(w2, ((0, P1 - S * C1), (0, P2 - S * C2)))
    b2 = jnp.pad(jnp.tile(cv2_b, S)[None, :], ((0, 0), (0, P2 - S * C2)))

    # ---- stage 3: ss2 + maxpool(2,2) + ToDense + channel-major flatten -> fc1 gather.
    Hm = (ho * scale2 - pool) // pool + 1
    Wm = (wo * scale2 - pool) // pool + 1
    assert fc1_w.shape[0] == C2 * Hm * Wm, (fc1_w.shape, C2 * Hm * Wm)
    mi = (np.arange(ho) * scale2) // pool
    mj = (np.arange(wo) * scale2) // pool
    # exactness requires each scaled active site to own its pool window:
    assert scale2 >= pool and len(set(mi.tolist())) == ho and len(set(mj.tolist())) == wo
    rows_fc1 = np.array([cc * (Hm * Wm) + mi[s // wo] * Wm + mj[s % wo]
                         for s in range(S) for cc in range(C2)], dtype=np.int32)
    w3 = fc1_w[rows_fc1, :]                                             # (S*C2, 128)
    w3 = jnp.pad(w3, ((0, P2 - S * C2), (0, 0)))                        # zero rows: exact
    b3 = fc1_b[None, :]

    w4 = fc2_w
    b4 = fc2_b[None, :]

    # Weights in bf16 (halves VMEM/weight DMA, native MXU path); biases stay f32.
    w1, w2, w3, w4 = (w.astype(compute_dtype) for w in (w1, w2, w3, w4))
    return w1, b1, w2, b2, w3, b3, w4, b4


# ------------------------------ forward pass -------------------------------

def net_forward(x_nchw, params, *, block_m=512):
    B, C, H, W = x_nchw.shape
    folded = fold_params(params, H=H, W=W)
    # w1 rows are indexed in NCHW order, so the raw input flattens for free
    # (no permute / jnp.pad / im2col on the activation path).  Input stays in its
    # native dtype (feed bf16 upstream if the data pipeline can deliver it); the
    # cast to the bf16 compute dtype happens inside the (DMA-bound) kernel.
    x_flat = x_nchw.reshape(B, C * H * W)
    return fused_forward(x_flat, *folded, block_m=block_m)


# ------------------ plain-JAX reference (validation only) ------------------

def reference_forward(x_nchw, params):
    """Straightforward dense-equivalent pipeline of the original sparse module."""
    x = jnp.transpose(x_nchw, (0, 2, 3, 1))                    # NHWC, fully active
    x = x * params["bn_scale"] + params["bn_shift"]            # BN (eval) on features
    x = jnp.pad(x, ((0, 0), (1, 1), (1, 1), (0, 0)))           # SparseZeroPad2d(1)

    def conv5(x, w, b):                                        # k = stride = 5
        Bb, H, Wd, C = x.shape
        ho, wo = H // 5, Wd // 5
        p = x.reshape(Bb, ho, 5, wo, 5, C).transpose(0, 1, 3, 2, 4, 5)
        p = p.reshape(Bb * ho * wo, 5 * 5 * C)
        return (p @ w.reshape(5 * 5 * C, -1) + b).reshape(Bb, ho, wo, -1)

    def scale5(y):                                             # SparseScale2d(5)
        Bb, H, Wd, C = y.shape
        z = jnp.zeros((Bb, H, 5, Wd, 5, C), y.dtype).at[:, :, 0, :, 0, :].set(y)
        return z.reshape(Bb, H * 5, Wd * 5, C)

    y = jax.nn.relu(conv5(x, params["cv1_w"], params["cv1_b"]))
    y = jax.nn.relu(conv5(scale5(y), params["cv2_w"], params["cv2_b"]))
    y = scale5(y)
    Bb, Hs, Ws, C = y.shape
    y = y.reshape(Bb, Hs // 2, 2, Ws // 2, 2, C).max(axis=(2, 4))   # maxpool 2,2
    flat = jnp.transpose(y, (0, 3, 1, 2)).reshape(Bb, -1)           # ToDense + flatten
    h = jax.nn.relu(flat @ params["fc1_w"] + params["fc1_b"])       # dropout1=id, fc1
    logits = h @ params["fc2_w"] + params["fc2_b"]                  # dropout2=id, fc2
    return jax.nn.log_softmax(logits, axis=-1)


# ------------------------------- parameters --------------------------------

def init_params(key, flat_dim):
    ks = jax.random.split(key, 8)

    def u(k, shape, fan_in):
        bound = 1.0 / float(fan_in) ** 0.5
        return jax.random.uniform(k, shape, jnp.float32, -bound, bound)

    # BatchNorm1d(3), eval mode with default params / running stats.
    eps = 1e-5
    gamma = jnp.ones((3,), jnp.float32)
    beta = jnp.zeros((3,), jnp.float32)
    running_mean = jnp.zeros((3,), jnp.float32)
    running_var = jnp.ones((3,), jnp.float32)
    scale = gamma / jnp.sqrt(running_var + eps)
    shift = beta - running_mean * scale

    return {
        "bn_scale": scale, "bn_shift": shift,
        # conv weights: (kh, kw, Cin, Cout)
        "cv1_w": u(ks[0], (5, 5, 3, 3), 5 * 5 * 3), "cv1_b": u(ks[1], (3,), 5 * 5 * 3),
        "cv2_w": u(ks[2], (5, 5, 3, 3), 5 * 5 * 3), "cv2_b": u(ks[3], (3,), 5 * 5 * 3),
        # linear weights: (in, out)
        "fc1_w": u(ks[4], (flat_dim, 128), flat_dim), "fc1_b": u(ks[5], (128,), flat_dim),
        "fc2_w": u(ks[6], (128, 10), 128), "fc2_b": u(ks[7], (10,), 128),
    }


if __name__ == "__main__":
    key = jax.random.PRNGKey(0)
    kx, kp = jax.random.split(key)

    # MNIST-like 3-channel input, PyTorch NCHW convention.
    B, C, H, W = 2, 3, 28, 28
    x = jax.random.normal(kx, (B, C, H, W), jnp.float32)

    # fc1 in-features derived from the actual pipeline geometry (675), see NOTE at top.
    Hp = H + 2
    h1 = (Hp - 5) // 5 + 1           # after cv1 (k=5, s=5)
    Hs = 5 * h1                      # after SparseScale2d(5)
    Hm = (Hs - 2) // 2 + 1           # after SparseMaxPool2d(2, 2)
    flat_dim = 3 * Hm * Hm

    params = init_params(kp, flat_dim)

    out = jax.block_until_ready(jax.jit(net_forward)(x, params))
    assert out.shape == (B, 10), out.shape
    # log_softmax rows must exponentiate-sum to 1.
    assert bool(jnp.allclose(jnp.sum(jnp.exp(out), axis=1), 1.0, atol=1e-4))

    # Validate the folded single-kernel path against the plain dense-equivalent pipeline
    # (loose tol absorbs bf16 weights / TPU matmul-precision differences, catches bugs).
    ref = jax.block_until_ready(jax.jit(reference_forward)(x, params))
    assert bool(jnp.allclose(out, ref, atol=5e-2, rtol=5e-2)), \
        float(jnp.max(jnp.abs(out - ref)))

    print("KERNEL_OK")
</pallas_src>

<mosaic_0001>
module attributes {stable_mosaic.version = 11 : i64} {
  func.func @_fused_net_kernel(%arg0: i32, %arg1: memref<8x2352xf32, #tpu.memory_space<vmem>>, %arg2: memref<2352x128xbf16, #tpu.memory_space<vmem>>, %arg3: memref<1x128xf32, #tpu.memory_space<vmem>>, %arg4: memref<128x128xbf16, #tpu.memory_space<vmem>>, %arg5: memref<1x128xf32, #tpu.memory_space<vmem>>, %arg6: memref<128x128xbf16, #tpu.memory_space<vmem>>, %arg7: memref<1x128xf32, #tpu.memory_space<vmem>>, %arg8: memref<128x10xbf16, #tpu.memory_space<vmem>>, %arg9: memref<1x10xf32, #tpu.memory_space<vmem>>, %arg10: memref<8x10xf32, #tpu.memory_space<vmem>>) attributes {dimension_semantics = [#tpu.dimension_semantics<parallel>], iteration_bounds = array<i64: 1>, scalar_prefetch = 0 : i64, scratch_operands = 0 : i64, tpu.core_type = #tpu.core_type<tc>, window_params = [{transform_indices = @transform_0, window_bounds = array<i64: 8, 2352>}, {pipeline_mode = #tpu.pipeline_mode<synchronous>, transform_indices = @transform_1, window_bounds = array<i64: 2352, 128>}, {pipeline_mode = #tpu.pipeline_mode<synchronous>, transform_indices = @transform_2, window_bounds = array<i64: 1, 128>}, {pipeline_mode = #tpu.pipeline_mode<synchronous>, transform_indices = @transform_3, window_bounds = array<i64: 128, 128>}, {pipeline_mode = #tpu.pipeline_mode<synchronous>, transform_indices = @transform_4, window_bounds = array<i64: 1, 128>}, {pipeline_mode = #tpu.pipeline_mode<synchronous>, transform_indices = @transform_5, window_bounds = array<i64: 128, 128>}, {pipeline_mode = #tpu.pipeline_mode<synchronous>, transform_indices = @transform_6, window_bounds = array<i64: 1, 128>}, {pipeline_mode = #tpu.pipeline_mode<synchronous>, transform_indices = @transform_7, window_bounds = array<i64: 128, 10>}, {pipeline_mode = #tpu.pipeline_mode<synchronous>, transform_indices = @transform_8, window_bounds = array<i64: 1, 10>}, {transform_indices = @transform_9, window_bounds = array<i64: 8, 10>}]} {
    %c0 = arith.constant 0 : index
    %c0_0 = arith.constant 0 : index
    %0 = vector.load %arg1[%c0, %c0_0] : memref<8x2352xf32, #tpu.memory_space<vmem>>, vector<8x2352xf32>
    %1 = arith.truncf %0 : vector<8x2352xf32> to vector<8x2352xbf16>
    %c0_1 = arith.constant 0 : index
    %c0_2 = arith.constant 0 : index
    %2 = vector.load %arg2[%c0_1, %c0_2] : memref<2352x128xbf16, #tpu.memory_space<vmem>>, vector<2352x128xbf16>
    %cst = arith.constant dense<0.000000e+00> : vector<8x128xf32>
    %3 = tpu.matmul %1, %2, %cst {dimension_numbers = #tpu.dot_dimension_numbers<[1], [0], [0], [1], [0, 0, 1, 1], [], []>} : vector<8x2352xbf16>, vector<2352x128xbf16>, vector<8x128xf32> -> vector<8x128xf32>
    %c0_3 = arith.constant 0 : index
    %c0_4 = arith.constant 0 : index
    %4 = vector.load %arg3[%c0_3, %c0_4] : memref<1x128xf32, #tpu.memory_space<vmem>>, vector<1x128xf32>
    %5 = vector.broadcast %4 : vector<1x128xf32> to vector<8x128xf32>
    %6 = arith.addf %3, %5 : vector<8x128xf32>
    %cst_5 = arith.constant 0.000000e+00 : f32
    %7 = vector.broadcast %cst_5 : f32 to vector<8x128xf32>
    %8 = arith.maximumf %6, %7 : vector<8x128xf32>
    %9 = arith.truncf %8 : vector<8x128xf32> to vector<8x128xbf16>
    %c0_6 = arith.constant 0 : index
    %c0_7 = arith.constant 0 : index
    %10 = vector.load %arg4[%c0_6, %c0_7] : memref<128x128xbf16, #tpu.memory_space<vmem>>, vector<128x128xbf16>
    %cst_8 = arith.constant dense<0.000000e+00> : vector<8x128xf32>
    %11 = tpu.matmul %9, %10, %cst_8 {dimension_numbers = #tpu.dot_dimension_numbers<[1], [0], [0], [1], [0, 0, 1, 1], [], []>} : vector<8x128xbf16>, vector<128x128xbf16>, vector<8x128xf32> -> vector<8x128xf32>
    %c0_9 = arith.constant 0 : index
    %c0_10 = arith.constant 0 : index
    %12 = vector.load %arg5[%c0_9, %c0_10] : memref<1x128xf32, #tpu.memory_space<vmem>>, vector<1x128xf32>
    %13 = vector.broadcast %12 : vector<1x128xf32> to vector<8x128xf32>
    %14 = arith.addf %11, %13 : vector<8x128xf32>
    %cst_11 = arith.constant 0.000000e+00 : f32
    %15 = vector.broadcast %cst_11 : f32 to vector<8x128xf32>
    %16 = arith.maximumf %14, %15 : vector<8x128xf32>
    %17 = arith.truncf %16 : vector<8x128xf32> to vector<8x128xbf16>
    %c0_12 = arith.constant 0 : index
    %c0_13 = arith.constant 0 : index
    %18 = vector.load %arg6[%c0_12, %c0_13] : memref<128x128xbf16, #tpu.memory_space<vmem>>, vector<128x128xbf16>
    %cst_14 = arith.constant dense<0.000000e+00> : vector<8x128xf32>
    %19 = tpu.matmul %17, %18, %cst_14 {dimension_numbers = #tpu.dot_dimension_numbers<[1], [0], [0], [1], [0, 0, 1, 1], [], []>} : vector<8x128xbf16>, vector<128x128xbf16>, vector<8x128xf32> -> vector<8x128xf32>
    %c0_15 = arith.constant 0 : index
    %c0_16 = arith.constant 0 : index
    %20 = vector.load %arg7[%c0_15, %c0_16] : memref<1x128xf32, #tpu.memory_space<vmem>>, vector<1x128xf32>
    %21 = vector.broadcast %20 : vector<1x128xf32> to vector<8x128xf32>
    %22 = arith.addf %19, %21 : vector<8x128xf32>
    %cst_17 = arith.constant 0.000000e+00 : f32
    %23 = vector.broadcast %cst_17 : f32 to vector<8x128xf32>
    %24 = arith.maximumf %22, %23 : vector<8x128xf32>
    %25 = arith.truncf %24 : vector<8x128xf32> to vector<8x128xbf16>
    %c0_18 = arith.constant 0 : index
    %c0_19 = arith.constant 0 : index
    %26 = vector.load %arg8[%c0_18, %c0_19] : memref<128x10xbf16, #tpu.memory_space<vmem>>, vector<128x10xbf16>
    %cst_20 = arith.constant dense<0.000000e+00> : vector<8x10xf32>
    %27 = tpu.matmul %25, %26, %cst_20 {dimension_numbers = #tpu.dot_dimension_numbers<[1], [0], [0], [1], [0, 0, 1, 1], [], []>} : vector<8x128xbf16>, vector<128x10xbf16>, vector<8x10xf32> -> vector<8x10xf32>
    %c0_21 = arith.constant 0 : index
    %c0_22 = arith.constant 0 : index
    %28 = vector.load %arg9[%c0_21, %c0_22] : memref<1x10xf32, #tpu.memory_space<vmem>>, vector<1x10xf32>
    %29 = vector.broadcast %28 : vector<1x10xf32> to vector<8x10xf32>
    %30 = arith.addf %27, %29 : vector<8x10xf32>
    %cst_23 = arith.constant dense<0xFF800000> : vector<8xf32>
    %31 = vector.multi_reduction <maximumf>, %30, %cst_23 [1] : vector<8x10xf32> to vector<8xf32>
    %32 = vector.shape_cast %31 : vector<8xf32> to vector<8x1xf32>
    %33 = vector.broadcast %32 : vector<8x1xf32> to vector<8x10xf32>
    %34 = arith.subf %30, %33 : vector<8x10xf32>
    %35 = math.exp %34 : vector<8x10xf32>
    %cst_24 = arith.constant dense<0.000000e+00> : vector<8xf32>
    %36 = vector.multi_reduction <add>, %35, %cst_24 [1] : vector<8x10xf32> to vector<8xf32>
    %37 = vector.shape_cast %36 : vector<8xf32> to vector<8x1xf32>
    %38 = math.log %37 : vector<8x1xf32>
    %39 = vector.broadcast %38 : vector<8x1xf32> to vector<8x10xf32>
    %40 = arith.subf %34, %39 : vector<8x10xf32>
    %c0_25 = arith.constant 0 : index
    %c0_26 = arith.constant 0 : index
    %41 = vector.load %arg10[%c0_25, %c0_26] : memref<8x10xf32, #tpu.memory_space<vmem>>, vector<8x10xf32>
    tpu.vector_store %arg10[%c0_25, %c0_26], %40 {strides = array<i32>} : memref<8x10xf32, #tpu.memory_space<vmem>>, vector<8x10xf32>,
    return
  }
  func.func @transform_0(%arg0: i32) -> (i32, i32) {
    %c0_i32 = arith.constant 0 : i32
    %c0_i32_0 = arith.constant 0 : i32
    return %arg0, %c0_i32 : i32, i32
  }
  func.func @transform_1(%arg0: i32) -> (i32, i32) {
    %c0_i32 = arith.constant 0 : i32
    %c0_i32_0 = arith.constant 0 : i32
    %c0_i32_1 = arith.constant 0 : i32
    return %c0_i32, %c0_i32_0 : i32, i32
  }
  func.func @transform_2(%arg0: i32) -> (i32, i32) {
    %c0_i32 = arith.constant 0 : i32
    %c0_i32_0 = arith.constant 0 : i32
    %c0_i32_1 = arith.constant 0 : i32
    return %c0_i32, %c0_i32_0 : i32, i32
  }
  func.func @transform_3(%arg0: i32) -> (i32, i32) {
    %c0_i32 = arith.constant 0 : i32
    %c0_i32_0 = arith.constant 0 : i32
    %c0_i32_1 = arith.constant 0 : i32
    return %c0_i32, %c0_i32_0 : i32, i32
  }
  func.func @transform_4(%arg0: i32) -> (i32, i32) {
    %c0_i32 = arith.constant 0 : i32
    %c0_i32_0 = arith.constant 0 : i32
    %c0_i32_1 = arith.constant 0 : i32
    return %c0_i32, %c0_i32_0 : i32, i32
  }
  func.func @transform_5(%arg0: i32) -> (i32, i32) {
    %c0_i32 = arith.constant 0 : i32
    %c0_i32_0 = arith.constant 0 : i32
    %c0_i32_1 = arith.constant 0 : i32
    return %c0_i32, %c0_i32_0 : i32, i32
  }
  func.func @transform_6(%arg0: i32) -> (i32, i32) {
    %c0_i32 = arith.constant 0 : i32
    %c0_i32_0 = arith.constant 0 : i32
    %c0_i32_1 = arith.constant 0 : i32
    return %c0_i32, %c0_i32_0 : i32, i32
  }
  func.func @transform_7(%arg0: i32) -> (i32, i32) {
    %c0_i32 = arith.constant 0 : i32
    %c0_i32_0 = arith.constant 0 : i32
    %c0_i32_1 = arith.constant 0 : i32
    return %c0_i32, %c0_i32_0 : i32, i32
  }
  func.func @transform_8(%arg0: i32) -> (i32, i32) {
    %c0_i32 = arith.constant 0 : i32
    %c0_i32_0 = arith.constant 0 : i32
    %c0_i32_1 = arith.constant 0 : i32
    return %c0_i32, %c0_i32_0 : i32, i32
  }
  func.func @transform_9(%arg0: i32) -> (i32, i32) {
    %c0_i32 = arith.constant 0 : i32
    %c0_i32_0 = arith.constant 0 : i32
    return %arg0, %c0_i32 : i32, i32
  }
}

</mosaic_0001>

<bundles_post_ra>
// kernel: tile.9
= control target key start
LH: loop header
LB: loop body
LE: loop exit
PB: predicated region body
PF: predicated region fallthrough
CT: control target
= control target key end

     0   :  { %s291_s10 = smov 105   ;;  %s292_s11 = smov 99   ;;  %vm3_vm0 = vcmask 23552   ;;  %vm9_vm1 = vcmask 884552   ;;  %vm15_vm2 = vcmask 859952   ;;  %vm21_vm3 = vcmask 835352   ;;  %s447_s0 = inlined_call_operand.vmem [shape: f32[36,3], index: 0, kind: input, shape index: {}]   ;;  %s448_s1 = inlined_call_operand.vmem [shape: f32[1,108], index: 1, kind: output, shape index: {}]  }
   0x1   :  { %v221_v0 = vld [vmem:[%s447_s0 + $0x23] sm:$0x1]   ;;  %v223_v1 = vld [vmem:[%s447_s0 + $0x21] sm:$0x1]   ;;  %v222_v2 = vld [vmem:[%s447_s0 + $0x22] sm:$0x1]  }
   0x2   :  { %7 = vrot.lane.b32.xlu0 %v221_v0, %s291_s10  ;;  %19 = vrot.lane.b32.xlu1 %v223_v1, %s292_s11  ;;  %v224_v3 = vld [vmem:[%s447_s0 + $0x20] sm:$0x1]   ;;  %s293_s16 = smov 102   ;;  %s294_s17 = smov 96   ;;  %v225_v4 = vld [vmem:[%s447_s0 + $0x1f] sm:$0x1]  }
   0x3   :  { %v226_v5 = vld [vmem:[%s447_s0 + $0x1e] sm:$0x1]   ;;  %s295_s22 = smov 93   ;;  %s296_s23 = smov 90   ;;  %v227_v6 = vld [vmem:[%s447_s0 + $0x1d] sm:$0x1]  }
   0x4   :  { %v228_v7 = vld [vmem:[%s447_s0 + $0x1c] sm:$0x1]   ;;  %s297_s28 = smov 87   ;;  %s298_s29 = smov 84   ;;  %v229_v8 = vld [vmem:[%s447_s0 + $0x1b] sm:$0x1]  }
   0x5   :  { %v230_v9 = vld [vmem:[%s447_s0 + $0x1a] sm:$0x1]   ;;  %s299_s5 = smov 81   ;;  %s300_s6 = smov 78   ;;  %v231_v10 = vld [vmem:[%s447_s0 + $0x19] sm:$0x1]  }
   0x6   :  { %13 = vrot.lane.b32.xlu0 %v222_v2, %s293_s16  ;;  %25 = vrot.lane.b32.xlu1 %v224_v3, %s294_s17  ;;  %v2_v11 = vld [vmem:[%s447_s0] sm:$0x1]   ;;  %v232_v12 = vld [vmem:[%s447_s0 + $0x18] sm:$0x1]   ;;  %s301_s13 = smov 75   ;;  %s302_s14 = smov 72  }
   0x7   :  { %4 = vst.msk [vmem:[#allocation0] sm:$0x1] %vm3_vm0, %v2_v11   ;;  %v233_v13 = vld [vmem:[%s447_s0 + $0x17] sm:$0x1]   ;;  %v234_v14 = vld [vmem:[%s447_s0 + $0x16] sm:$0x1]  }
   0x8   :  { %s303_s19 = smov 69   ;;  %s304_s20 = smov 66   ;;  %v235_v15 = vld [vmem:[%s447_s0 + $0x15] sm:$0x1]   ;;  %v236_v16 = vld [vmem:[%s447_s0 + $0x14] sm:$0x1]  }
   0x9   :  { %s305_s25 = smov 63   ;;  %s306_s26 = smov 60   ;;  %v237_v17 = vld [vmem:[%s447_s0 + $0x13] sm:$0x1]   ;;  %v238_v18 = vld [vmem:[%s447_s0 + $0x12] sm:$0x1]  }
   0xa   :  { %31 = vrot.lane.b32.xlu0 %v225_v4, %s295_s22  ;;  %37 = vrot.lane.b32.xlu1 %v226_v5, %s296_s23  ;;  %s307_s2 = smov 57   ;;  %s308_s3 = smov 54   ;;  %v239_v19 = vld [vmem:[%s447_s0 + $0x11] sm:$0x1]   ;;  %v240_v20 = vld [vmem:[%s447_s0 + $0x10] sm:$0x1]  }
   0xb   :  { %s309_s8 = smov 51   ;;  %s310_s9 = smov 48   ;;  %v241_v21 = vld [vmem:[%s447_s0 + $0xf] sm:$0x1]   ;;  %v242_v22 = vld [vmem:[%s447_s0 + $0xe] sm:$0x1]  }
   0xc   :  { %s312_s15 = smov 42   ;;  %v243_v23 = vld [vmem:[%s447_s0 + $0xd] sm:$0x1]   ;;  %v244_v24 = vld [vmem:[%s447_s0 + $0xc] sm:$0x1]   ;;  %s314_s21 = smov 36  }
   0xd   :  { %v245_v25 = vld [vmem:[%s447_s0 + $0xb] sm:$0x1]   ;;  %v246_v26 = vld [vmem:[%s447_s0 + $0xa] sm:$0x1]   ;;  %s316_s27 = smov 30   ;;  %s318_s4 = smov 24  }
   0xe   :  { %43 = vrot.lane.b32.xlu0 %v227_v6, %s297_s28  ;;  %49 = vrot.lane.b32.xlu1 %v228_v7, %s298_s29  ;;  %v247_v27 = vld [vmem:[%s447_s0 + $0x9] sm:$0x1]   ;;  %v248_v28 = vld [vmem:[%s447_s0 + $0x8] sm:$0x1]   ;;  %s320_s10 = smov 18   ;;  %s322_s16 = smov 12  }
   0xf   :  { %v249_v29 = vld [vmem:[%s447_s0 + $0x7] sm:$0x1]   ;;  %v250_v30 = vld [vmem:[%s447_s0 + $0x6] sm:$0x1]   ;;  %v251_v31 = vld [vmem:[%s447_s0 + $0x5] sm:$0x1]  }
  0x10   :  { %v252_v32 = vld [vmem:[%s447_s0 + $0x4] sm:$0x1]   ;;  %v253_v33 = vld [vmem:[%s447_s0 + $0x3] sm:$0x1]   ;;  %v254_v34 = vld [vmem:[%s447_s0 + $0x2] sm:$0x1]  }
  0x11   :  { %s324_s22 = smov 6   ;;  %v255_v35 = vld [vmem:[%s447_s0 + $0x1] sm:$0x1]   ;;  %s325_s0 = smov 3   ;;  %vm27_vm4 = vcmask 810752   ;;  %vm33_vm5 = vcmask 786152  }
  0x12   :  { %55 = vrot.lane.b32.xlu0 %v229_v8, %s299_s5  ;;  %61 = vrot.lane.b32.xlu1 %v230_v9, %s300_s6  ;;  %vm39_vm6 = vcmask 761552   ;;  %vm45_vm7 = vcmask 736952   ;;  %vm51_vm8 = vcmask 712352   ;;  %vm57_vm9 = vcmask 687752  }
  0x13   :  { %vm63_vm10 = vcmask 663152   ;;  %vm69_vm11 = vcmask 638552   ;;  %vm75_vm12 = vcmask 613952   ;;  %vm81_vm13 = vcmask 589352  }
  0x14   :  { %vm87_vm14 = vcmask 564752   ;;  %vm93_vm15 = vcmask 540152   ;;  %vm99_vm0 = vcmask 515552  }
  0x16   :  { %67 = vrot.lane.b32.xlu0 %v231_v10, %s301_s13  ;;  %73 = vrot.lane.b32.xlu1 %v232_v12, %s302_s14  ;;  %s311_s14 = smov 45  }
  0x1a   :  { %79 = vrot.lane.b32.xlu0 %v233_v13, %s303_s19  ;;  %85 = vrot.lane.b32.xlu1 %v234_v14, %s304_s20  ;;  %s313_s20 = smov 39  }
  0x1e   :  { %91 = vrot.lane.b32.xlu0 %v235_v15, %s305_s25  ;;  %97 = vrot.lane.b32.xlu1 %v236_v16, %s306_s26  ;;  %s315_s26 = smov 33  }
  0x22   :  { %103 = vrot.lane.b32.xlu0 %v237_v17, %s307_s2  ;;  %109 = vrot.lane.b32.xlu1 %v238_v18, %s308_s3  ;;  %s317_s3 = smov 27  }
  0x26   :  { %115 = vrot.lane.b32.xlu0 %v239_v19, %s309_s8  ;;  %121 = vrot.lane.b32.xlu1 %v240_v20, %s310_s9  ;;  %s319_s9 = smov 21  }
  0x2a   :  { %127 = vrot.lane.b32.xlu0 %v241_v21, %s311_s14  ;;  %133 = vrot.lane.b32.xlu1 %v242_v22, %s312_s15  ;;  %s321_s15 = smov 15  }
  0x2e   :  { %139 = vrot.lane.b32.xlu0 %v243_v23, %s313_s20  ;;  %145 = vrot.lane.b32.xlu1 %v244_v24, %s314_s21  ;;  %s323_s21 = smov 9  }
  0x32   :  { %151 = vrot.lane.b32.xlu0 %v245_v25, %s315_s26  ;;  %157 = vrot.lane.b32.xlu1 %v246_v26, %s316_s27 }
  0x36   :  { %163 = vrot.lane.b32.xlu0 %v247_v27, %s317_s3  ;;  %169 = vrot.lane.b32.xlu1 %v248_v28, %s318_s4 }
  0x3a   :  { %175 = vrot.lane.b32.xlu0 %v249_v29, %s319_s9  ;;  %181 = vrot.lane.b32.xlu1 %v250_v30, %s320_s10 }
  0x3e   :  { %187 = vrot.lane.b32.xlu0 %v251_v31, %s321_s15  ;;  %193 = vrot.lane.b32.xlu1 %v252_v32, %s322_s16 }
  0x42   :  { %199 = vrot.lane.b32.xlu0 %v253_v33, %s323_s21  ;;  %205 = vrot.lane.b32.xlu1 %v254_v34, %s324_s22 }
  0x46   :  { %211 = vrot.lane.b32.xlu0 %v255_v35, %s325_s0 }
  0x74   :  { %v8_v36 = vpop.permute.xlu0 %7   ;;  %v20_v37 = vpop.permute.xlu1 %19  }
  0x75   :  { %10 = vst.msk [vmem:[#allocation0] sm:$0x1] %vm9_vm1, %v8_v36   ;;  %vm105_vm1 = vcmask 490952  }
  0x78   :  { %v14_v38 = vpop.permute.xlu0 %13   ;;  %v26_v39 = vpop.permute.xlu1 %25  }
  0x79   :  { %16 = vst.msk [vmem:[#allocation0] sm:$0x1] %vm15_vm2, %v14_v38   ;;  %vm111_vm2 = vcmask 466352  }
  0x7a   :  { %22 = vst.msk [vmem:[#allocation0] sm:$0x1] %vm21_vm3, %v20_v37   ;;  %vm117_vm3 = vcmask 441752  }
  0x7b   :  { %28 = vst.msk [vmem:[#allocation0] sm:$0x1] %vm27_vm4, %v26_v39   ;;  %vm123_vm4 = vcmask 417152  }
  0x7c   :  { %v32_v40 = vpop.permute.xlu0 %31   ;;  %v38_v41 = vpop.permute.xlu1 %37  }
  0x7d   :  { %34 = vst.msk [vmem:[#allocation0] sm:$0x1] %vm33_vm5, %v32_v40   ;;  %vm129_vm5 = vcmask 392552  }
  0x7e   :  { %40 = vst.msk [vmem:[#allocation0] sm:$0x1] %vm39_vm6, %v38_v41   ;;  %vm135_vm6 = vcmask 367952  }
  0x80   :  { %v44_v42 = vpop.permute.xlu0 %43   ;;  %v50_v43 = vpop.permute.xlu1 %49  }
  0x81   :  { %46 = vst.msk [vmem:[#allocation0] sm:$0x1] %vm45_vm7, %v44_v42   ;;  %vm141_vm7 = vcmask 343352  }
  0x82   :  { %52 = vst.msk [vmem:[#allocation0] sm:$0x1] %vm51_vm8, %v50_v43   ;;  %vm147_vm8 = vcmask 318752  }
  0x84   :  { %v56_v44 = vpop.permute.xlu0 %55   ;;  %v62_v45 = vpop.permute.xlu1 %61  }
  0x85   :  { %58 = vst.msk [vmem:[#allocation0] sm:$0x1] %vm57_vm9, %v56_v44   ;;  %vm153_vm9 = vcmask 294152  }
  0x86   :  { %64 = vst.msk [vmem:[#allocation0] sm:$0x1] %vm63_vm10, %v62_v45   ;;  %vm159_vm10 = vcmask 269552  }
  0x88   :  { %v68_v46 = vpop.permute.xlu0 %67   ;;  %v74_v47 = vpop.permute.xlu1 %73  }
  0x89   :  { %70 = vst.msk [vmem:[#allocation0] sm:$0x1] %vm69_vm11, %v68_v46   ;;  %vm165_vm11 = vcmask 244952  }
  0x8a   :  { %76 = vst.msk [vmem:[#allocation0] sm:$0x1] %vm75_vm12, %v74_v47   ;;  %vm171_vm12 = vcmask 220352  }
  0x8c   :  { %v80_v48 = vpop.permute.xlu0 %79   ;;  %v86_v49 = vpop.permute.xlu1 %85  }
  0x8d   :  { %82 = vst.msk [vmem:[#allocation0] sm:$0x1] %vm81_vm13, %v80_v48   ;;  %vm177_vm13 = vcmask 195752  }
  0x8e   :  { %88 = vst.msk [vmem:[#allocation0] sm:$0x1] %vm87_vm14, %v86_v49   ;;  %vm183_vm14 = vcmask 171152  }
  0x90   :  { %v92_v50 = vpop.permute.xlu0 %91   ;;  %v98_v51 = vpop.permute.xlu1 %97  }
  0x91   :  { %94 = vst.msk [vmem:[#allocation0] sm:$0x1] %vm93_vm15, %v92_v50   ;;  %vm189_vm15 = vcmask 146552  }
  0x92   :  { %100 = vst.msk [vmem:[#allocation0] sm:$0x1] %vm99_vm0, %v98_v51   ;;  %vm195_vm0 = vcmask 121952  }
  0x94   :  { %v104_v52 = vpop.permute.xlu0 %103   ;;  %v110_v53 = vpop.permute.xlu1 %109  }
  0x95   :  { %106 = vst.msk [vmem:[#allocation0] sm:$0x1] %vm105_vm1, %v104_v52   ;;  %vm201_vm1 = vcmask 97352  }
  0x96   :  { %112 = vst.msk [vmem:[#allocation0] sm:$0x1] %vm111_vm2, %v110_v53   ;;  %vm207_vm2 = vcmask 72752  }
  0x98   :  { %v116_v54 = vpop.permute.xlu0 %115   ;;  %v122_v55 = vpop.permute.xlu1 %121  }
  0x99   :  { %118 = vst.msk [vmem:[#allocation0] sm:$0x1] %vm117_vm3, %v116_v54   ;;  %vm213_vm3 = vcmask 48152  }
  0x9a   :  { %124 = vst.msk [vmem:[#allocation0] sm:$0x1] %vm123_vm4, %v122_v55  }
  0x9c   :  { %v128_v56 = vpop.permute.xlu0 %127   ;;  %v134_v57 = vpop.permute.xlu1 %133  }
  0x9d   :  { %130 = vst.msk [vmem:[#allocation0] sm:$0x1] %vm129_vm5, %v128_v56  }
  0x9e   :  { %136 = vst.msk [vmem:[#allocation0] sm:$0x1] %vm135_vm6, %v134_v57  }
  0xa0   :  { %v140_v58 = vpop.permute.xlu0 %139   ;;  %v146_v59 = vpop.permute.xlu1 %145  }
  0xa1   :  { %142 = vst.msk [vmem:[#allocation0] sm:$0x1] %vm141_vm7, %v140_v58  }
  0xa2   :  { %148 = vst.msk [vmem:[#allocation0] sm:$0x1] %vm147_vm8, %v146_v59  }
  0xa4   :  { %v152_v60 = vpop.permute.xlu0 %151   ;;  %v158_v61 = vpop.permute.xlu1 %157  }
  0xa5   :  { %154 = vst.msk [vmem:[#allocation0] sm:$0x1] %vm153_vm9, %v152_v60  }
  0xa6   :  { %160 = vst.msk [vmem:[#allocation0] sm:$0x1] %vm159_vm10, %v158_v61  }
  0xa8   :  { %v164_v62 = vpop.permute.xlu0 %163   ;;  %v170_v63 = vpop.permute.xlu1 %169  }
  0xa9   :  { %166 = vst.msk [vmem:[#allocation0] sm:$0x1] %vm165_vm11, %v164_v62  }
  0xaa   :  { %172 = vst.msk [vmem:[#allocation0] sm:$0x1] %vm171_vm12, %v170_v63  }
  0xac   :  { %v176_v0 = vpop.permute.xlu0 %175   ;;  %v182_v1 = vpop.permute.xlu1 %181  }
  0xad   :  { %178 = vst.msk [vmem:[#allocation0] sm:$0x1] %vm177_vm13, %v176_v0  }
  0xae   :  { %184 = vst.msk [vmem:[#allocation0] sm:$0x1] %vm183_vm14, %v182_v1  }
  0xb0   :  { %v188_v2 = vpop.permute.xlu0 %187   ;;  %v194_v3 = vpop.permute.xlu1 %193  }
  0xb1   :  { %190 = vst.msk [vmem:[#allocation0] sm:$0x1] %vm189_vm15, %v188_v2  }
  0xb2   :  { %196 = vst.msk [vmem:[#allocation0] sm:$0x1] %vm195_vm0, %v194_v3  }
  0xb4   :  { %v200_v4 = vpop.permute.xlu0 %199   ;;  %v206_v5 = vpop.permute.xlu1 %205  }
  0xb5   :  { %202 = vst.msk [vmem:[#allocation0] sm:$0x1] %vm201_vm1, %v200_v4  }
  0xb6   :  { %208 = vst.msk [vmem:[#allocation0] sm:$0x1] %vm207_vm2, %v206_v5  }
  0xb8   :  { %v212_v6 = vpop.permute.xlu0 %211  }
  0xb9   :  { %214 = vst.msk [vmem:[#allocation0] sm:$0x1] %vm213_vm3, %v212_v6  }
  0xc0   :  { %v218_v7 = vld [vmem:[#allocation0] sm:$0x1] }
  0xc1   :  { %220 = vst [vmem:[%s448_s1] sm:$0x1] %v218_v7 }

// kernel: net_forward.1
= control target key start
LH: loop header
LB: loop body
LE: loop exit
PB: predicated region body
PF: predicated region fallthrough
CT: control target
= control target key end

     0   :  { %vm2668_vm0 = vmmov 0   ;;  %vm1254_vm1 = vcmask 392192   ;;  %vm1997_vm2 = vcmask 80896   ;;  %s3342_s1 = inlined_call_operand.vmem [shape: bf16[2352,128], index: 1, kind: input, shape index: {}]   ;;  %s3343_s0 = inlined_call_operand.vmem [shape: f32[8,2352], index: 0, kind: input, shape index: {}]   ;;  %s3344_s3 = inlined_call_operand.vmem [shape: bf16[128,128], index: 3, kind: input, shape index: {}]   ;;  %s3345_s2 = inlined_call_operand.vmem [shape: f32[1,128], index: 2, kind: input, shape index: {}]   ;;  %s3346_s5 = inlined_call_operand.vmem [shape: bf16[128,128], index: 5, kind: input, shape index: {}]   ;;  %s3347_s7 = inlined_call_operand.vmem [shape: bf16[128,10], index: 7, kind: input, shape index: {}]   ;;  %s3348_s4 = inlined_call_operand.vmem [shape: f32[1,128], index: 4, kind: input, shape index: {}]   ;;  %s3349_s6 = inlined_call_operand.vmem [shape: f32[1,128], index: 6, kind: input, shape index: {}]   ;;  %s3350_s8 = inlined_call_operand.vmem [shape: f32[1,10], index: 8, kind: input, shape index: {}]   ;;  %s3351_s9 = inlined_call_operand.vmem [shape: f32[8,10], index: 9, kind: output, shape index: {}]  }
   0x1   :  { %v2492_v0 = vld [vmem:[%s3342_s1 + $0x40] sm:$0xff]   ;;  %v2496_v4 = vld [vmem:[%s3342_s1 + $0x48] sm:$0xff]   ;;  %v2500_v8 = vld [vmem:[%s3342_s1 + $0x50] sm:$0xff]  }
   0x2   :  { %v2493_v1 = vld [vmem:[%s3342_s1] sm:$0xff]   ;;  %2191 = vmatprep.subr.bf16.mxu0 %v2492_v0  ;;  %v2497_v5 = vld [vmem:[%s3342_s1 + $0x8] sm:$0xff]   ;;  %v2501_v9 = vld [vmem:[%s3342_s1 + $0x10] sm:$0xff]  }
   0x3   :  { %v2494_v2 = vld [vmem:[%s3342_s1 + $0xc0] sm:$0xff]   ;;  %2192 = vmatpush3.bf16.msra.mxu0 %v2493_v1  ;;  %v2498_v6 = vld [vmem:[%s3342_s1 + $0xc8] sm:$0xff]   ;;  %v2502_v10 = vld [vmem:[%s3342_s1 + $0xd0] sm:$0xff]  }
   0x4   :  { %v2495_v3 = vld [vmem:[%s3342_s1 + $0x80] sm:$0xff]   ;;  %2213 = vmatprep.subr.bf16.mxu1 %v2494_v2  ;;  %2193 = vmatprep.subr.bf16.mxu0 %v2496_v4  ;;  %v2499_v7 = vld [vmem:[%s3342_s1 + $0x88] sm:$0xff]   ;;  %v2503_v11 = vld [vmem:[%s3342_s1 + $0x90] sm:$0xff]  }
   0x5   :  { %2214 = vmatpush3.bf16.msra.mxu1 %v2495_v3  ;;  %v2504_v12 = vld [vmem:[%s3342_s1 + $0x58] sm:$0xff]   ;;  %v2508_v16 = vld [vmem:[%s3342_s1 + $0x60] sm:$0xff]   ;;  %v2512_v20 = vld [vmem:[%s3342_s1 + $0x68] sm:$0xff]  }
   0x6   :  { %2215 = vmatprep.subr.bf16.mxu1 %v2498_v6  ;;  %v2505_v13 = vld [vmem:[%s3342_s1 + $0x18] sm:$0xff]   ;;  %v2509_v17 = vld [vmem:[%s3342_s1 + $0x20] sm:$0xff]   ;;  %v2513_v21 = vld [vmem:[%s3342_s1 + $0x28] sm:$0xff]  }
   0x7   :  { %2194 = vmatpush3.bf16.msra.mxu0 %v2497_v5  ;;  %v2506_v14 = vld [vmem:[%s3342_s1 + $0xd8] sm:$0xff]   ;;  %v2510_v18 = vld [vmem:[%s3342_s1 + $0xe0] sm:$0xff]   ;;  %v2514_v22 = vld [vmem:[%s3342_s1 + $0xe8] sm:$0xff]  }
   0x8   :  { %2195 = vmatprep.subr.bf16.mxu0 %v2500_v8  ;;  %v2507_v15 = vld [vmem:[%s3342_s1 + $0x98] sm:$0xff]   ;;  %v2511_v19 = vld [vmem:[%s3342_s1 + $0xa0] sm:$0xff]   ;;  %v2515_v23 = vld [vmem:[%s3342_s1 + $0xa8] sm:$0xff]  }
   0x9   :  { %2216 = vmatpush3.bf16.msra.mxu1 %v2499_v7  ;;  %v2516_v24 = vld [vmem:[%s3342_s1 + $0x70] sm:$0xff]   ;;  %v2520_v28 = vld [vmem:[%s3342_s1 + $0x78] sm:$0xff]   ;;  %v34_v31 = vld [vmem:[%s3343_s0 + $0x8] sm:$0xff] }
   0xa   :  { %2217 = vmatprep.subr.bf16.mxu1 %v2502_v10  ;;  %v2517_v25 = vld [vmem:[%s3342_s1 + $0x30] sm:$0xff]   ;;  %v2521_v29 = vld [vmem:[%s3342_s1 + $0x38] sm:$0xff]   ;;  %v53_v32 = vpack.c.bf16 %v34_v31, %v34_v31  ;;  %v33_v34 = vld [vmem:[%s3343_s0] sm:$0xff] }
   0xb   :  { %2196 = vmatpush3.bf16.msra.mxu0 %v2501_v9  ;;  %v2518_v26 = vld [vmem:[%s3342_s1 + $0xf0] sm:$0xff]   ;;  %v2522_v30 = vld [vmem:[%s3342_s1 + $0xf8] sm:$0xff]   ;;  %v52_v35 = vpack.c.bf16 %v33_v34, %v33_v34  ;;  %v2524_v36 = vld [vmem:[%s3342_s1 + $0x140] sm:$0xff]  }
   0xc   :  { %2197 = vmatprep.subr.bf16.mxu0 %v2504_v12  ;;  %v2519_v27 = vld [vmem:[%s3342_s1 + $0xb0] sm:$0xff]   ;;  %v2523_v33 = vld [vmem:[%s3342_s1 + $0xb8] sm:$0xff]   ;;  %1290 = vmatprep.mubr.bf16.mxu0 %v53_v32  ;;  %v2525_v39 = vld [vmem:[%s3342_s1 + $0x100] sm:$0xff]  }
   0xd   :  { %2218 = vmatpush3.bf16.msra.mxu1 %v2503_v11  ;;  %v36_v37 = vld [vmem:[%s3343_s0 + $0x18] sm:$0xff]  ;;  %v35_v40 = vld [vmem:[%s3343_s0 + $0x10] sm:$0xff]  ;;  %v2526_v42 = vld [vmem:[%s3342_s1 + $0x1c0] sm:$0xff]  }
   0xe   :  { %2219 = vmatprep.subr.bf16.mxu1 %v2506_v14  ;;  %v55_v38 = vpack.c.bf16 %v36_v37, %v36_v37  ;;  %v54_v41 = vpack.c.bf16 %v35_v40, %v35_v40  ;;  %v2527_v43 = vld [vmem:[%s3342_s1 + $0x180] sm:$0xff]   ;;  %v2528_v44 = vld [vmem:[%s3342_s1 + $0x148] sm:$0xff]   ;;  %v2532_v48 = vld [vmem:[%s3342_s1 + $0x150] sm:$0xff]  }
   0xf   :  { %2198 = vmatpush3.bf16.msra.mxu0 %v2505_v13  ;;  %v2529_v45 = vld [vmem:[%s3342_s1 + $0x108] sm:$0xff]   ;;  %v2533_v49 = vld [vmem:[%s3342_s1 + $0x110] sm:$0xff]   ;;  %v2536_v52 = vld [vmem:[%s3342_s1 + $0x158] sm:$0xff]  }
  0x10   :  { %2199 = vmatprep.subr.bf16.mxu0 %v2508_v16  ;;  %1330 = vmatprep.mubr.bf16.mxu1 %v55_v38  ;;  %v2530_v46 = vld [vmem:[%s3342_s1 + $0x1c8] sm:$0xff]   ;;  %v2534_v50 = vld [vmem:[%s3342_s1 + $0x1d0] sm:$0xff]   ;;  %v2537_v53 = vld [vmem:[%s3342_s1 + $0x118] sm:$0xff]  }
  0x11   :  { %2220 = vmatpush3.bf16.msra.mxu1 %v2507_v15  ;;  %v2531_v47 = vld [vmem:[%s3342_s1 + $0x188] sm:$0xff]   ;;  %v2535_v51 = vld [vmem:[%s3342_s1 + $0x190] sm:$0xff]   ;;  %v2538_v54 = vld [vmem:[%s3342_s1 + $0x1d8] sm:$0xff]  }
  0x12   :  { %2221 = vmatprep.subr.bf16.mxu1 %v2510_v18  ;;  %v2539_v55 = vld [vmem:[%s3342_s1 + $0x198] sm:$0xff]   ;;  %v2540_v56 = vld [vmem:[%s3342_s1 + $0x160] sm:$0xff]   ;;  %v2544_v60 = vld [vmem:[%s3342_s1 + $0x168] sm:$0xff]  }
  0x13   :  { %2200 = vmatpush3.bf16.msra.mxu0 %v2509_v17  ;;  %v2541_v57 = vld [vmem:[%s3342_s1 + $0x120] sm:$0xff]   ;;  %v2545_v61 = vld [vmem:[%s3342_s1 + $0x128] sm:$0xff]   ;;  %v2548_v0 = vld [vmem:[%s3342_s1 + $0x170] sm:$0xff]  }
  0x14   :  { %2201 = vmatprep.subr.bf16.mxu0 %v2512_v20  ;;  %v2542_v58 = vld [vmem:[%s3342_s1 + $0x1e0] sm:$0xff]   ;;  %v2546_v62 = vld [vmem:[%s3342_s1 + $0x1e8] sm:$0xff]   ;;  %v2549_v1 = vld [vmem:[%s3342_s1 + $0x130] sm:$0xff]  }
  0x15   :  { %2222 = vmatpush3.bf16.msra.mxu1 %v2511_v19  ;;  %v2543_v59 = vld [vmem:[%s3342_s1 + $0x1a0] sm:$0xff]   ;;  %v2547_v63 = vld [vmem:[%s3342_s1 + $0x1a8] sm:$0xff]   ;;  %v2550_v2 = vld [vmem:[%s3342_s1 + $0x1f0] sm:$0xff]  }
  0x16   :  { %2223 = vmatprep.subr.bf16.mxu1 %v2514_v22  ;;  %v2551_v3 = vld [vmem:[%s3342_s1 + $0x1b0] sm:$0xff]   ;;  %v2552_v4 = vld [vmem:[%s3342_s1 + $0x178] sm:$0xff]   ;;  %v38_v7 = vld [vmem:[%s3343_s0 + $0x28] sm:$0xff] }
  0x17   :  { %2202 = vmatpush3.bf16.msra.mxu0 %v2513_v21  ;;  %v2553_v5 = vld [vmem:[%s3342_s1 + $0x138] sm:$0xff]   ;;  %v57_v8 = vpack.c.bf16 %v38_v7, %v38_v7  ;;  %v37_v10 = vld [vmem:[%s3343_s0 + $0x20] sm:$0xff]  ;;  %v39_v16 = vld [vmem:[%s3343_s0 + $0x30] sm:$0xff] }
  0x18   :  { %2203 = vmatprep.subr.bf16.mxu0 %v2516_v24  ;;  %v2554_v6 = vld [vmem:[%s3342_s1 + $0x1f8] sm:$0xff]   ;;  %v56_v11 = vpack.c.bf16 %v37_v10, %v37_v10  ;;  %v2556_v12 = vld [vmem:[%s3342_s1 + $0x240] sm:$0xff]   ;;  %v58_v17 = vpack.c.bf16 %v39_v16, %v39_v16  ;;  %v2560_v20 = vld [vmem:[%s3342_s1 + $0x248] sm:$0xff]  }
  0x19   :  { %2224 = vmatpush3.bf16.msra.mxu1 %v2515_v23  ;;  %v2555_v9 = vld [vmem:[%s3342_s1 + $0x1b8] sm:$0xff]   ;;  %v2557_v15 = vld [vmem:[%s3342_s1 + $0x200] sm:$0xff]   ;;  %v2561_v21 = vld [vmem:[%s3342_s1 + $0x208] sm:$0xff]  }
  0x1a   :  { %2225 = vmatprep.subr.bf16.mxu1 %v2518_v26  ;;  %v40_v13 = vld [vmem:[%s3343_s0 + $0x38] sm:$0xff]  ;;  %v2558_v18 = vld [vmem:[%s3342_s1 + $0x2c0] sm:$0xff]   ;;  %v2562_v22 = vld [vmem:[%s3342_s1 + $0x2c8] sm:$0xff]  }
  0x1b   :  { %2204 = vmatpush3.bf16.msra.mxu0 %v2517_v25  ;;  %v59_v14 = vpack.c.bf16 %v40_v13, %v40_v13  ;;  %v2559_v19 = vld [vmem:[%s3342_s1 + $0x280] sm:$0xff]   ;;  %v2563_v23 = vld [vmem:[%s3342_s1 + $0x288] sm:$0xff]   ;;  %v2564_v24 = vld [vmem:[%s3342_s1 + $0x250] sm:$0xff]  }
  0x1c   :  { %2205 = vmatprep.subr.bf16.mxu0 %v2520_v28  ;;  %v2565_v25 = vld [vmem:[%s3342_s1 + $0x210] sm:$0xff]   ;;  %v2568_v28 = vld [vmem:[%s3342_s1 + $0x258] sm:$0xff]   ;;  %v2572_v32 = vld [vmem:[%s3342_s1 + $0x260] sm:$0xff]  }
  0x1d   :  { %2226 = vmatpush3.bf16.msra.mxu1 %v2519_v27  ;;  %v2566_v26 = vld [vmem:[%s3342_s1 + $0x2d0] sm:$0xff]   ;;  %v2571_v31 = vld [vmem:[%s3342_s1 + $0x298] sm:$0xff]   ;;  %v2574_v34 = vld [vmem:[%s3342_s1 + $0x2e0] sm:$0xff]  }
  0x1e   :  { %2227 = vmatprep.subr.bf16.mxu1 %v2522_v30  ;;  %v2567_v27 = vld [vmem:[%s3342_s1 + $0x290] sm:$0xff]   ;;  %v2570_v30 = vld [vmem:[%s3342_s1 + $0x2d8] sm:$0xff]   ;;  %v2577_v37 = vld [vmem:[%s3342_s1 + $0x228] sm:$0xff]  }
  0x1f   :  { %2206 = vmatpush3.bf16.msra.mxu0 %v2521_v29  ;;  %v2569_v29 = vld [vmem:[%s3342_s1 + $0x218] sm:$0xff]   ;;  %v2578_v38 = vld [vmem:[%s3342_s1 + $0x2e8] sm:$0xff]   ;;  %v2580_v40 = vld [vmem:[%s3342_s1 + $0x270] sm:$0xff]  }
  0x20   :  { %2235 = vmatprep.subr.bf16.mxu0 %v2524_v36  ;;  %v2576_v36 = vld [vmem:[%s3342_s1 + $0x268] sm:$0xff]   ;;  %v2603_v7 = vld [vmem:[%s3342_s1 + $0x398] sm:$0xff]   ;;  %v2606_v10 = vld [vmem:[%s3342_s1 + $0x3e0] sm:$0xff]  }
  0x21   :  { %2228 = vmatpush3.bf16.msra.mxu1 %v2523_v33  ;;  %v2573_v33 = vld [vmem:[%s3342_s1 + $0x220] sm:$0xff]   ;;  %v2609_v13 = vld [vmem:[%s3342_s1 + $0x328] sm:$0xff]   ;;  %v2612_v16 = vld [vmem:[%s3342_s1 + $0x370] sm:$0xff]  }
  0x22   :  { %1291 = vmatmul.mubr.bf16.vlgmr.msra.gmra.mrb[0].mxu0 %v52_v35  ;;  %2257 = vmatprep.subr.bf16.mxu1 %v2526_v42  ;;  %v2575_v35 = vld [vmem:[%s3342_s1 + $0x2a0] sm:$0xff]   ;;  %v2582_v42 = vld [vmem:[%s3342_s1 + $0x2f0] sm:$0xff]  }
  0x23   :  { %2236 = vmatpush3.bf16.msra.mxu0 %v2525_v39  ;;  %1370 = vmatprep.mubr.bf16.mxu0 %v57_v8  ;;  %v2579_v39 = vld [vmem:[%s3342_s1 + $0x2a8] sm:$0xff]   ;;  %v2604_v8 = vld [vmem:[%s3342_s1 + $0x360] sm:$0xff]  }
  0x24   :  { %1331 = vmatmul.mubr.bf16.vlgmr.msra.gmra.mrb[0].mxu1 %v54_v41  ;;  %2237 = vmatprep.subr.bf16.mxu0 %v2528_v44  ;;  %v2581_v41 = vld [vmem:[%s3342_s1 + $0x230] sm:$0xff]   ;;  %v2584_v44 = vld [vmem:[%s3342_s1 + $0x278] sm:$0xff]  }
  0x25   :  { %2258 = vmatpush3.bf16.msra.mxu1 %v2527_v43  ;;  %1410 = vmatprep.mubr.bf16.mxu1 %v59_v14  ;;  %v2583_v43 = vld [vmem:[%s3342_s1 + $0x2b0] sm:$0xff]   ;;  %v2610_v14 = vld [vmem:[%s3342_s1 + $0x3e8] sm:$0xff]  }
  0x26   :  { %2259 = vmatprep.subr.bf16.mxu1 %v2530_v46  ;;  %v2586_v46 = vld [vmem:[%s3342_s1 + $0x2f8] sm:$0xff]  }
  0x27   :  { %2238 = vmatpush3.bf16.msra.mxu0 %v2529_v45  ;;  %v2585_v45 = vld [vmem:[%s3342_s1 + $0x238] sm:$0xff]  }
  0x28   :  { %2239 = vmatprep.subr.bf16.mxu0 %v2532_v48 }
  0x29   :  { %2260 = vmatpush3.bf16.msra.mxu1 %v2531_v47  ;;  %v42_v47 = vld [vmem:[%s3343_s0 + $0x48] sm:$0xff] }
  0x2a   :  { %2261 = vmatprep.subr.bf16.mxu1 %v2534_v50  ;;  %v61_v48 = vpack.c.bf16 %v42_v47, %v42_v47  ;;  %v41_v50 = vld [vmem:[%s3343_s0 + $0x40] sm:$0xff]  ;;  %v2631_v47 = vld [vmem:[%s3342_s1 + $0x428] sm:$0xff]  }
  0x2b   :  { %2240 = vmatpush3.bf16.msra.mxu0 %v2533_v49  ;;  %v2587_v49 = vld [vmem:[%s3342_s1 + $0x2b8] sm:$0xff]  }
  0x2c   :  { %2241 = vmatprep.subr.bf16.mxu0 %v2536_v52  ;;  %v2588_v52 = vld [vmem:[%s3342_s1 + $0x340] sm:$0xff]  }
  0x2d   :  { %2262 = vmatpush3.bf16.msra.mxu1 %v2535_v51  ;;  %v60_v51 = vpack.c.bf16 %v41_v50, %v41_v50  ;;  %v2633_v50 = vld [vmem:[%s3342_s1 + $0x470] sm:$0xff]  }
  0x2e   :  { %2263 = vmatprep.subr.bf16.mxu1 %v2538_v54 }
  0x2f   :  { %2242 = vmatpush3.bf16.msra.mxu0 %v2537_v53  ;;  %v44_v53 = vld [vmem:[%s3343_s0 + $0x58] sm:$0xff] }
  0x30   :  { %2243 = vmatprep.subr.bf16.mxu0 %v2540_v56  ;;  %v63_v54 = vpack.c.bf16 %v44_v53, %v44_v53  ;;  %v43_v56 = vld [vmem:[%s3343_s0 + $0x50] sm:$0xff] }
  0x31   :  { %2264 = vmatpush3.bf16.msra.mxu1 %v2539_v55  ;;  %v2589_v55 = vld [vmem:[%s3342_s1 + $0x300] sm:$0xff]   ;;  %v2634_v53 = vld [vmem:[%s3342_s1 + $0x430] sm:$0xff]  }
  0x32   :  { %2265 = vmatprep.subr.bf16.mxu1 %v2542_v58  ;;  %v2590_v58 = vld [vmem:[%s3342_s1 + $0x3c0] sm:$0xff]  }
  0x33   :  { %2244 = vmatpush3.bf16.msra.mxu0 %v2541_v57  ;;  %v62_v57 = vpack.c.bf16 %v43_v56, %v43_v56  ;;  %v49_v56 = vld [vmem:[%s3343_s0 + $0x80] sm:$0xff] }
  0x34   :  { %2245 = vmatprep.subr.bf16.mxu0 %v2544_v60  ;;  %v2592_v60 = vld [vmem:[%s3342_s1 + $0x348] sm:$0xff]  }
  0x35   :  { %2266 = vmatpush3.bf16.msra.mxu1 %v2543_v59  ;;  %v2591_v59 = vld [vmem:[%s3342_s1 + $0x380] sm:$0xff]  }
  0x36   :  { %2267 = vmatprep.subr.bf16.mxu1 %v2546_v62  ;;  %v2594_v62 = vld [vmem:[%s3342_s1 + $0x3c8] sm:$0xff]  }
  0x37   :  { %2246 = vmatpush3.bf16.msra.mxu0 %v2545_v61  ;;  %v2593_v61 = vld [vmem:[%s3342_s1 + $0x308] sm:$0xff]  }
  0x38   :  { %2247 = vmatprep.subr.bf16.mxu0 %v2548_v0  ;;  %v2596_v0 = vld [vmem:[%s3342_s1 + $0x350] sm:$0xff]  }
  0x39   :  { %2268 = vmatpush3.bf16.msra.mxu1 %v2547_v63  ;;  %v2595_v63 = vld [vmem:[%s3342_s1 + $0x388] sm:$0xff]  }
  0x3a   :  { %2269 = vmatprep.subr.bf16.mxu1 %v2550_v2  ;;  %v2598_v2 = vld [vmem:[%s3342_s1 + $0x3d0] sm:$0xff]  }
  0x3b   :  { %2248 = vmatpush3.bf16.msra.mxu0 %v2549_v1  ;;  %v2597_v1 = vld [vmem:[%s3342_s1 + $0x310] sm:$0xff]  }
  0x3c   :  { %2249 = vmatprep.subr.bf16.mxu0 %v2552_v4  ;;  %v2600_v4 = vld [vmem:[%s3342_s1 + $0x358] sm:$0xff]  }
  0x3d   :  { %2270 = vmatpush3.bf16.msra.mxu1 %v2551_v3  ;;  %v2599_v3 = vld [vmem:[%s3342_s1 + $0x390] sm:$0xff]  }
  0x3e   :  { %2271 = vmatprep.subr.bf16.mxu1 %v2554_v6  ;;  %v2602_v6 = vld [vmem:[%s3342_s1 + $0x3d8] sm:$0xff]  }
  0x3f   :  { %2250 = vmatpush3.bf16.msra.mxu0 %v2553_v5  ;;  %v2601_v5 = vld [vmem:[%s3342_s1 + $0x318] sm:$0xff]  }
  0x40   :  { %2279 = vmatprep.subr.bf16.mxu0 %v2556_v12  ;;  %v2608_v12 = vld [vmem:[%s3342_s1 + $0x368] sm:$0xff]  }
  0x41   :  { %2272 = vmatpush3.bf16.msra.mxu1 %v2555_v9  ;;  %v2605_v9 = vld [vmem:[%s3342_s1 + $0x320] sm:$0xff]  }
  0x42   :  { %1371 = vmatmul.mubr.bf16.vlgmr.msra.gmra.mrb[4].mxu0 %v56_v11  ;;  %2301 = vmatprep.subr.bf16.mxu1 %v2558_v18  ;;  %v2607_v11 = vld [vmem:[%s3342_s1 + $0x3a0] sm:$0xff]   ;;  %v2614_v18 = vld [vmem:[%s3342_s1 + $0x3f0] sm:$0xff]  }
  0x43   :  { %2280 = vmatpush3.bf16.msra.mxu0 %v2557_v15  ;;  %1450 = vmatprep.mubr.bf16.mxu0 %v61_v48  ;;  %v2611_v15 = vld [vmem:[%s3342_s1 + $0x3a8] sm:$0xff]  }
  0x44   :  { %1411 = vmatmul.mubr.bf16.vlgmr.msra.gmra.mrb[4].mxu1 %v58_v17  ;;  %2281 = vmatprep.subr.bf16.mxu0 %v2560_v20  ;;  %v2613_v17 = vld [vmem:[%s3342_s1 + $0x330] sm:$0xff]   ;;  %v2616_v20 = vld [vmem:[%s3342_s1 + $0x378] sm:$0xff]  }
  0x45   :  { %2302 = vmatpush3.bf16.msra.mxu1 %v2559_v19  ;;  %1490 = vmatprep.mubr.bf16.mxu1 %v63_v54  ;;  %v2615_v19 = vld [vmem:[%s3342_s1 + $0x3b0] sm:$0xff]   ;;  %v2636_v54 = vld [vmem:[%s3342_s1 + $0x478] sm:$0xff]  }
  0x46   :  { %2303 = vmatprep.subr.bf16.mxu1 %v2562_v22  ;;  %v2618_v22 = vld [vmem:[%s3342_s1 + $0x3f8] sm:$0xff]  }
  0x47   :  { %2282 = vmatpush3.bf16.msra.mxu0 %v2561_v21  ;;  %v2617_v21 = vld [vmem:[%s3342_s1 + $0x338] sm:$0xff]  }
  0x48   :  { %2283 = vmatprep.subr.bf16.mxu0 %v2564_v24 }
  0x49   :  { %2304 = vmatpush3.bf16.msra.mxu1 %v2563_v23  ;;  %v46_v23 = vld [vmem:[%s3343_s0 + $0x68] sm:$0xff] }
  0x4a   :  { %2305 = vmatprep.subr.bf16.mxu1 %v2566_v26  ;;  %v65_v24 = vpack.c.bf16 %v46_v23, %v46_v23  ;;  %v45_v26 = vld [vmem:[%s3343_s0 + $0x60] sm:$0xff] }
  0x4b   :  { %2284 = vmatpush3.bf16.msra.mxu0 %v2565_v25  ;;  %v2619_v25 = vld [vmem:[%s3342_s1 + $0x3b8] sm:$0xff]  }
  0x4c   :  { %2285 = vmatprep.subr.bf16.mxu0 %v2568_v28  ;;  %v2620_v28 = vld [vmem:[%s3342_s1 + $0x440] sm:$0xff]  }
  0x4d   :  { %2306 = vmatpush3.bf16.msra.mxu1 %v2567_v27  ;;  %v64_v27 = vpack.c.bf16 %v45_v26, %v45_v26 }
  0x4e   :  { %2307 = vmatprep.subr.bf16.mxu1 %v2570_v30 }
  0x4f   :  { %2286 = vmatpush3.bf16.msra.mxu0 %v2569_v29  ;;  %v48_v29 = vld [vmem:[%s3343_s0 + $0x78] sm:$0xff] }
  0x50   :  { %2287 = vmatprep.subr.bf16.mxu0 %v2572_v32  ;;  %v67_v30 = vpack.c.bf16 %v48_v29, %v48_v29  ;;  %v47_v32 = vld [vmem:[%s3343_s0 + $0x70] sm:$0xff] }
  0x51   :  { %2308 = vmatpush3.bf16.msra.mxu1 %v2571_v31  ;;  %v2621_v31 = vld [vmem:[%s3342_s1 + $0x400] sm:$0xff]  }
  0x52   :  { %2309 = vmatprep.subr.bf16.mxu1 %v2574_v34  ;;  %v2622_v34 = vld [vmem:[%s3342_s1 + $0x448] sm:$0xff]  }
  0x53   :  { %2288 = vmatpush3.bf16.msra.mxu0 %v2573_v33  ;;  %v66_v33 = vpack.c.bf16 %v47_v32, %v47_v32 }
  0x54   :  { %2289 = vmatprep.subr.bf16.mxu0 %v2576_v36  ;;  %v2667_v36 = vmov 0.0  }
  0x55   :  { %2310 = vmatpush3.bf16.msra.mxu1 %v2575_v35  ;;  %v2623_v35 = vld [vmem:[%s3342_s1 + $0x408] sm:$0xff]  }
  0x56   :  { %2311 = vmatprep.subr.bf16.mxu1 %v2578_v38  ;;  %v2625_v38 = vld [vmem:[%s3342_s1 + $0x410] sm:$0xff]  }
  0x57   :  { %2290 = vmatpush3.bf16.msra.mxu0 %v2577_v37  ;;  %v2624_v37 = vld [vmem:[%s3342_s1 + $0x450] sm:$0xff]  }
  0x58   :  { %2291 = vmatprep.subr.bf16.mxu0 %v2580_v40  ;;  %v2627_v40 = vld [vmem:[%s3342_s1 + $0x418] sm:$0xff]  }
  0x59   :  { %2312 = vmatpush3.bf16.msra.mxu1 %v2579_v39  ;;  %v2626_v39 = vld [vmem:[%s3342_s1 + $0x458] sm:$0xff]  }
  0x5a   :  { %2313 = vmatprep.subr.bf16.mxu1 %v2582_v42  ;;  %v2632_v42 = vld [vmem:[%s3342_s1 + $0x480] sm:$0xff]  }
  0x5b   :  { %2292 = vmatpush3.bf16.msra.mxu0 %v2581_v41  ;;  %v2628_v41 = vld [vmem:[%s3342_s1 + $0x460] sm:$0xff]  }
  0x5c   :  { %2293 = vmatprep.subr.bf16.mxu0 %v2584_v44  ;;  %v2630_v44 = vld [vmem:[%s3342_s1 + $0x468] sm:$0xff]  }
  0x5d   :  { %2314 = vmatpush3.bf16.msra.mxu1 %v2583_v43  ;;  %v2629_v43 = vld [vmem:[%s3342_s1 + $0x420] sm:$0xff]  }
  0x5e   :  { %2315 = vmatprep.subr.bf16.mxu1 %v2586_v46  ;;  %v50_v46 = vld [vmem:[%s3343_s0 + $0x88] sm:$0xff] }
  0x5f   :  { %2294 = vmatpush3.bf16.msra.mxu0 %v2585_v45  ;;  %v2635_v45 = vld [vmem:[%s3342_s1 + $0x488] sm:$0xff]   ;;  %v69_v48 = vpack.c.bf16 %v50_v46, %v50_v46 }
  0x60   :  { %2323 = vmatprep.subr.bf16.mxu0 %v2588_v52 }
  0x61   :  { %2316 = vmatpush3.bf16.msra.mxu1 %v2587_v49  ;;  %v2638_v49 = vld [vmem:[%s3342_s1 + $0x490] sm:$0xff]  }
  0x62   :  { %1451 = vmatmul.mubr.bf16.vlgmr.msra.gmra.mrb[8].mxu0 %v60_v51  ;;  %2345 = vmatprep.subr.bf16.mxu1 %v2590_v58  ;;  %v51_v51 = vld [vmem:[%s3343_s0 + $0x90] sm:$0xff]  ;;  %v2639_v58 = vld [vmem:[%s3344_s3] sm:$0xff]  }
  0x63   :  { %2324 = vmatpush3.bf16.msra.mxu0 %v2589_v55  ;;  %1530 = vmatprep.mubr.bf16.mxu0 %v65_v24  ;;  %v70_v52 = vpack.c.bf16 %v51_v51, %v51_v51  ;;  %v2637_v55 = vld [vmem:[%s3342_s1 + $0x438] sm:$0xff]   ;;  %v2652_v24 = vld [vmem:[%s3346_s5 + $0x28] sm:$0xff]  }
  0x64   :  { %1491 = vmatmul.mubr.bf16.vlgmr.msra.gmra.mrb[8].mxu1 %v62_v57  ;;  %2325 = vmatprep.subr.bf16.mxu0 %v2592_v60  ;;  %v68_v57 = vpack.c.bf16 %v49_v56, %v49_v56  ;;  %v2641_v60 = vld [vmem:[%s3344_s3 + $0x10] sm:$0xff]  }
  0x65   :  { %2346 = vmatpush3.bf16.msra.mxu1 %v2591_v59  ;;  %1570 = vmatprep.mubr.bf16.mxu1 %v67_v30  ;;  %v2640_v59 = vld [vmem:[%s3344_s3 + $0x8] sm:$0xff]  }
  0x66   :  { %2347 = vmatprep.subr.bf16.mxu1 %v2594_v62  ;;  %v2643_v62 = vld [vmem:[%s3344_s3 + $0x20] sm:$0xff]  }
  0x67   :  { %2326 = vmatpush3.bf16.msra.mxu0 %v2593_v61  ;;  %v2642_v61 = vld [vmem:[%s3344_s3 + $0x18] sm:$0xff]  }
  0x68   :  { %2327 = vmatprep.subr.bf16.mxu0 %v2596_v0  ;;  %v2015_v0 = vld [vmem:[%s3345_s2] ss:$0 sm:$0xff] }
  0x69   :  { %2348 = vmatpush3.bf16.msra.mxu1 %v2595_v63 }
  0x6a   :  { %2349 = vmatprep.subr.bf16.mxu1 %v2598_v2 }
  0x6b   :  { %2328 = vmatpush3.bf16.msra.mxu0 %v2597_v1 }
  0x6c   :  { %2329 = vmatprep.subr.bf16.mxu0 %v2600_v4 }
  0x6d   :  { %2350 = vmatpush3.bf16.msra.mxu1 %v2599_v3 }
  0x6e   :  { %2351 = vmatprep.subr.bf16.mxu1 %v2602_v6 }
  0x6f   :  { %2330 = vmatpush3.bf16.msra.mxu0 %v2601_v5 }
  0x70   :  { %2331 = vmatprep.subr.bf16.mxu0 %v2604_v8  ;;  %v2644_v8 = vld [vmem:[%s3344_s3 + $0x28] sm:$0xff]  }
  0x71   :  { %2352 = vmatpush3.bf16.msra.mxu1 %v2603_v7 }
  0x72   :  { %2353 = vmatprep.subr.bf16.mxu1 %v2606_v10 }
  0x73   :  { %2332 = vmatpush3.bf16.msra.mxu0 %v2605_v9 }
  0x74   :  { %2333 = vmatprep.subr.bf16.mxu0 %v2608_v12 }
  0x75   :  { %2354 = vmatpush3.bf16.msra.mxu1 %v2607_v11 }
  0x76   :  { %2355 = vmatprep.subr.bf16.mxu1 %v2610_v14  ;;  %v2646_v14 = vld [vmem:[%s3344_s3 + $0x38] sm:$0xff]  }
  0x77   :  { %2334 = vmatpush3.bf16.msra.mxu0 %v2609_v13  ;;  %v2645_v13 = vld [vmem:[%s3344_s3 + $0x30] sm:$0xff]  }
  0x78   :  { %2335 = vmatprep.subr.bf16.mxu0 %v2612_v16  ;;  %v2648_v16 = vld [vmem:[%s3346_s5 + $0x8] sm:$0xff]  }
  0x79   :  { %2356 = vmatpush3.bf16.msra.mxu1 %v2611_v15  ;;  %v2647_v15 = vld [vmem:[%s3346_s5] sm:$0xff]  }
  0x7a   :  { %2357 = vmatprep.subr.bf16.mxu1 %v2614_v18  ;;  %v2650_v18 = vld [vmem:[%s3346_s5 + $0x18] sm:$0xff]  }
  0x7b   :  { %2336 = vmatpush3.bf16.msra.mxu0 %v2613_v17  ;;  %v2649_v17 = vld [vmem:[%s3346_s5 + $0x10] sm:$0xff]  }
  0x7c   :  { %2337 = vmatprep.subr.bf16.mxu0 %v2616_v20 }
  0x7d   :  { %2358 = vmatpush3.bf16.msra.mxu1 %v2615_v19  ;;  %v2651_v19 = vld [vmem:[%s3346_s5 + $0x20] sm:$0xff]  }
  0x7e   :  { %2359 = vmatprep.subr.bf16.mxu1 %v2618_v22 }
  0x7f   :  { %2338 = vmatpush3.bf16.msra.mxu0 %v2617_v21 }
  0x80   :  { %2367 = vmatprep.subr.bf16.mxu0 %v2620_v28 }
  0x81   :  { %2360 = vmatpush3.bf16.msra.mxu1 %v2619_v25 }
  0x82   :  { %1531 = vmatmul.mubr.bf16.vlgmr.msra.gmra.mrb[12].mxu0 %v64_v27  ;;  %2420 = vmatprep.subr.bf16.mxu1 %v2667_v36 }
  0x83   :  { %2368 = vmatpush3.bf16.msra.mxu0 %v2621_v31  ;;  %1610 = vmatprep.mubr.bf16.mxu0 %v69_v48 }
  0x84   :  { %1571 = vmatmul.mubr.bf16.vlgmr.msra.gmra.mrb[12].mxu1 %v66_v33  ;;  %2369 = vmatprep.subr.bf16.mxu0 %v2622_v34 }
  0x85   :  { %2426 = vmatprep.mubr.msk.bf16.mxu1 %vm2668_vm0, %v2667_v36  ;;  %2421 = vmatpush3.bf16.msra.mxu1 %v2632_v42 }
  0x86   :  { %2422 = vmatprep.subr.bf16.mxu1 %v2667_v36 }
  0x87   :  { %2370 = vmatpush3.bf16.msra.mxu0 %v2623_v35 }
  0x88   :  { %2371 = vmatprep.subr.bf16.mxu0 %v2624_v37 }
  0x89   :  { %2423 = vmatpush3.bf16.msra.mxu1 %v2635_v45 }
  0x8a   :  { %2424 = vmatprep.subr.bf16.mxu1 %v2667_v36 }
  0x8b   :  { %2372 = vmatpush3.bf16.msra.mxu0 %v2625_v38 }
  0x8c   :  { %2373 = vmatprep.subr.bf16.mxu0 %v2626_v39 }
  0x8d   :  { %2425 = vmatpush3.bf16.msra.mxu1 %v2638_v49 }
  0x8e   :  { %2430 = vmatprep.subr.bf16.mxu1 %v2667_v36 }
  0x8f   :  { %2374 = vmatpush3.bf16.msra.mxu0 %v2627_v40 }
  0x90   :  { %2375 = vmatprep.subr.bf16.mxu0 %v2628_v41  ;;  %2427 = vmatmul.mubr.msk.bf16.vlgmr.msra.gmra.mrb[16].mxu1 %vm1254_vm1, %v70_v52 }
  0x91   :  { %2446 = vmatprep.mubr.msk.bf16.mxu1 %vm2668_vm0, %v2667_v36  ;;  %2431 = vmatpush3.bf16.msra.mxu1 %v2639_v58 }
  0x92   :  { %2432 = vmatprep.subr.bf16.mxu1 %v2667_v36 }
  0x93   :  { %2376 = vmatpush3.bf16.msra.mxu0 %v2629_v43 }
  0x94   :  { %2377 = vmatprep.subr.bf16.mxu0 %v2630_v44 }
  0x95   :  { %2433 = vmatpush3.bf16.msra.mxu1 %v2640_v59 }
  0x96   :  { %2434 = vmatprep.subr.bf16.mxu1 %v2667_v36 }
  0x97   :  { %2378 = vmatpush3.bf16.msra.mxu0 %v2631_v47 }
  0x98   :  { %2379 = vmatprep.subr.bf16.mxu0 %v2633_v50 }
  0x99   :  { %2435 = vmatpush3.bf16.msra.mxu1 %v2641_v60 }
  0x9a   :  { %2436 = vmatprep.subr.bf16.mxu1 %v2667_v36 }
  0x9b   :  { %2380 = vmatpush3.bf16.msra.mxu0 %v2634_v53 }
  0x9c   :  { %2381 = vmatprep.subr.bf16.mxu0 %v2636_v54 }
  0x9d   :  { %2437 = vmatpush3.bf16.msra.mxu1 %v2642_v61 }
  0x9e   :  { %2438 = vmatprep.subr.bf16.mxu1 %v2667_v36 }
  0x9f   :  { %2382 = vmatpush3.bf16.msra.mxu0 %v2637_v55 }
  0xa0   :  { %2450 = vmatprep.subr.bf16.mxu0 %v2667_v36 }
  0xa1   :  { %2439 = vmatpush3.bf16.msra.mxu1 %v2643_v62 }
  0xa2   :  { %1611 = vmatmul.mubr.bf16.vlgmr.msra.gmra.mrb[16].mxu0 %v68_v57  ;;  %2440 = vmatprep.subr.bf16.mxu1 %v2667_v36 }
  0xa3   :  { %2466 = vmatprep.mubr.msk.bf16.mxu0 %vm2668_vm0, %v2667_v36  ;;  %2451 = vmatpush3.bf16.msra.mxu0 %v2647_v15  ;;  %v2164_v15 = vld [vmem:[%s3348_s4] ss:$0 sm:$0xff] }
  0xa4   :  { %2452 = vmatprep.subr.bf16.mxu0 %v2667_v36 }
  0xa5   :  { %2441 = vmatpush3.bf16.msra.mxu1 %v2644_v8  ;;  %v2654_v8 = vld [vmem:[%s3346_s5 + $0x38] sm:$0xff]  }
  0xa6   :  { %2442 = vmatprep.subr.bf16.mxu1 %v2667_v36 }
  0xa7   :  { %2453 = vmatpush3.bf16.msra.mxu0 %v2648_v16 }
  0xa8   :  { %2454 = vmatprep.subr.bf16.mxu0 %v2667_v36 }
  0xa9   :  { %2443 = vmatpush3.bf16.msra.mxu1 %v2645_v13  ;;  %v2659_v13 = vld [vmem:[%s3347_s7 + $0x20] sm:$0xff]  }
  0xaa   :  { %2444 = vmatprep.subr.bf16.mxu1 %v2667_v36 }
  0xab   :  { %2455 = vmatpush3.bf16.msra.mxu0 %v2649_v17 }
  0xac   :  { %2456 = vmatprep.subr.bf16.mxu0 %v2667_v36 }
  0xad   :  { %2445 = vmatpush3.bf16.msra.mxu1 %v2646_v14  ;;  %v2660_v14 = vld [vmem:[%s3347_s7 + $0x28] sm:$0xff]  }
  0xae   :  { %2470 = vmatprep.subr.bf16.mxu1 %v2667_v36 }
  0xaf   :  { %2457 = vmatpush3.bf16.msra.mxu0 %v2650_v18 }
  0xb0   :  { %2458 = vmatprep.subr.bf16.mxu0 %v2667_v36 }
  0xb3   :  { %2459 = vmatpush3.bf16.msra.mxu0 %v2651_v19 }
  0xb4   :  { %2460 = vmatprep.subr.bf16.mxu0 %v2667_v36 }
  0xb7   :  { %2461 = vmatpush3.bf16.msra.mxu0 %v2652_v24  ;;  %v2662_v24 = vld [vmem:[%s3347_s7 + $0x38] sm:$0xff]  }
  0xb8   :  { %2462 = vmatprep.subr.bf16.mxu0 %v2667_v36 }
  0xf5   :  { %v2207_v63 = vpop.f32.mrb[0].mxu0 }
  0xf6   :  { %v2208_v1 = vpop.f32.mrb[1].mxu0 }
  0xf7   :  { %v2209_v2 = vadd.f32 %v2208_v1, %v2207_v63  ;;  %v2210_v3 = vpop.f32.mrb[2].mxu0  ;;  %v2229_v4 = vpop.f32.mrb[0].mxu1 }
  0xf8   :  { %v2211_v5 = vpop.f32.mrb[3].mxu0  ;;  %v2230_v7 = vpop.f32.mrb[1].mxu1 }
  0xf9   :  { %v1293_v6 = vadd.f32 %v2209_v2, %v2015_v0  ;;  %v2231_v9 = vadd.f32 %v2230_v7, %v2229_v4  ;;  %v2232_v10 = vpop.f32.mrb[2].mxu1  ;;  %v2653_v7 = vld [vmem:[%s3346_s5 + $0x30] sm:$0xff]  }
  0xfa   :  { %v2233_v11 = vpop.f32.mrb[3].mxu1  ;;  %2463 = vmatpush3.bf16.msra.mxu0 %v2653_v7  ;;  %v2656_v10 = vld [vmem:[%s3347_s7 + $0x8] sm:$0xff]  }
  0xfb   :  { %v1333_v12 = vadd.f32 %v2231_v9, %v1293_v6  ;;  %2464 = vmatprep.subr.bf16.mxu0 %v2667_v36  ;;  %v2655_v9 = vld [vmem:[%s3347_s7] sm:$0xff]   ;;  %v2657_v11 = vld [vmem:[%s3347_s7 + $0x10] sm:$0xff]  }
  0xfe   :  { %2465 = vmatpush3.bf16.msra.mxu0 %v2654_v8 }
 0x115   :  { %v2251_v20 = vpop.f32.mrb[4].mxu0 }
 0x116   :  { %v2252_v21 = vpop.f32.mrb[5].mxu0 }
 0x117   :  { %v2253_v22 = vadd.f32 %v2252_v21, %v2251_v20  ;;  %v2254_v23 = vpop.f32.mrb[6].mxu0  ;;  %v2273_v25 = vpop.f32.mrb[4].mxu1 }
 0x118   :  { %v2255_v26 = vpop.f32.mrb[7].mxu0  ;;  %v2274_v28 = vpop.f32.mrb[5].mxu1  ;;  %v2661_v23 = vld [vmem:[%s3347_s7 + $0x30] sm:$0xff]  }
 0x119   :  { %v1373_v27 = vadd.f32 %v2253_v22, %v1333_v12  ;;  %v2275_v29 = vadd.f32 %v2274_v28, %v2273_v25  ;;  %v2276_v30 = vpop.f32.mrb[6].mxu1  ;;  %v2658_v12 = vld [vmem:[%s3347_s7 + $0x18] sm:$0xff]   ;;  %v2173_v25 = vld [vmem:[%s3349_s6] ss:$0 sm:$0xff] }
 0x11a   :  { %v2277_v31 = vpop.f32.mrb[7].mxu1 }
 0x11b   :  { %v1413_v32 = vadd.f32 %v2275_v29, %v1373_v27 }
 0x135   :  { %v2295_v33 = vpop.f32.mrb[8].mxu0 }
 0x136   :  { %v2296_v34 = vpop.f32.mrb[9].mxu0 }
 0x137   :  { %v2297_v35 = vadd.f32 %v2296_v34, %v2295_v33  ;;  %v2298_v37 = vpop.f32.mrb[10].mxu0  ;;  %v2317_v38 = vpop.f32.mrb[8].mxu1 }
 0x138   :  { %v2299_v39 = vpop.f32.mrb[11].mxu0  ;;  %v2318_v40 = vpop.f32.mrb[9].mxu1 }
 0x139   :  { %v1453_v41 = vadd.f32 %v2297_v35, %v1413_v32  ;;  %v2319_v42 = vadd.f32 %v2318_v40, %v2317_v38  ;;  %v2320_v43 = vpop.f32.mrb[10].mxu1 }
 0x13a   :  { %v2321_v44 = vpop.f32.mrb[11].mxu1 }
 0x13b   :  { %v1493_v45 = vadd.f32 %v2319_v42, %v1453_v41 }
 0x155   :  { %v2339_v46 = vpop.f32.mrb[12].mxu0 }
 0x156   :  { %v2340_v47 = vpop.f32.mrb[13].mxu0 }
 0x157   :  { %v2341_v48 = vadd.f32 %v2340_v47, %v2339_v46  ;;  %v2342_v49 = vpop.f32.mrb[14].mxu0  ;;  %v2361_v50 = vpop.f32.mrb[12].mxu1 }
 0x158   :  { %v2343_v51 = vpop.f32.mrb[15].mxu0  ;;  %v2362_v53 = vpop.f32.mrb[13].mxu1 }
 0x159   :  { %v1533_v52 = vadd.f32 %v2341_v48, %v1493_v45  ;;  %v2363_v54 = vadd.f32 %v2362_v53, %v2361_v50  ;;  %v2364_v55 = vpop.f32.mrb[14].mxu1 }
 0x15a   :  { %v2365_v56 = vpop.f32.mrb[15].mxu1 }
 0x15b   :  { %v1573_v57 = vadd.f32 %v2363_v54, %v1533_v52 }
 0x163   :  { %v1652_v58 = vpop.f32.mrb[16].mxu1 }
 0x164   :  { %v2428_v59 = vpop.f32.mrb[17].mxu1 }
 0x165   :  { %v1655_v60 = vpop.f32.mrb[18].mxu1 }
 0x166   :  { %v2429_v61 = vpop.f32.mrb[19].mxu1 }
 0x175   :  { %v2383_v62 = vpop.f32.mrb[16].mxu0 }
 0x176   :  { %v2384_v63 = vpop.f32.mrb[17].mxu0 }
 0x177   :  { %v2385_v0 = vadd.f32 %v2384_v63, %v2383_v62  ;;  %v2386_v1 = vpop.f32.mrb[18].mxu0 }
 0x178   :  { %v2387_v2 = vpop.f32.mrb[19].mxu0 }
 0x179   :  { %v1613_v3 = vadd.f32 %v2385_v0, %v1573_v57 }
 0x17b   :  { %v1653_v4 = vadd.f32 %v1652_v58, %v1613_v3 }
 0x17d   :  { %v1658_v5 = vmax.f32 %v1653_v4, 0.0 }
 0x17f   :  { %v1659_v6 = vpack.c.bf16 %v1658_v5, %v1658_v5 }
 0x181   :  { %2447 = vmatmul.mubr.bf16.vlgmr.msra.gmra.mrb[20].mxu1 %v1659_v6 }
 0x182   :  { %2486 = vmatprep.mubr.msk.bf16.mxu1 %vm2668_vm0, %v2667_v36  ;;  %2471 = vmatpush3.bf16.msra.mxu1 %v2655_v9 }
 0x183   :  { %2472 = vmatprep.subr.bf16.mxu1 %v2667_v36 }
 0x186   :  { %2473 = vmatpush3.bf16.msra.mxu1 %v2656_v10 }
 0x187   :  { %2474 = vmatprep.subr.bf16.mxu1 %v2667_v36 }
 0x18a   :  { %2475 = vmatpush3.bf16.msra.mxu1 %v2657_v11 }
 0x18b   :  { %2476 = vmatprep.subr.bf16.mxu1 %v2667_v36 }
 0x18e   :  { %2477 = vmatpush3.bf16.msra.mxu1 %v2658_v12 }
 0x18f   :  { %2478 = vmatprep.subr.bf16.mxu1 %v2667_v36 }
 0x192   :  { %2479 = vmatpush3.bf16.msra.mxu1 %v2659_v13 }
 0x193   :  { %2480 = vmatprep.subr.bf16.mxu1 %v2667_v36 }
 0x196   :  { %2481 = vmatpush3.bf16.msra.mxu1 %v2660_v14 }
 0x197   :  { %2482 = vmatprep.subr.bf16.mxu1 %v2667_v36 }
 0x19a   :  { %2483 = vmatpush3.bf16.msra.mxu1 %v2661_v23 }
 0x19b   :  { %2484 = vmatprep.subr.bf16.mxu1 %v2667_v36  ;;  %v2182_v36 = vld [vmem:[%s3350_s8] ss:$0 sm:$0xff] }
 0x19e   :  { %2485 = vmatpush3.bf16.msra.mxu1 %v2662_v24 }
 0x254   :  { %v1765_v16 = vpop.f32.mrb[20].mxu1 }
 0x255   :  { %v1766_v17 = vadd.f32 %v2164_v15, %v1765_v16  ;;  %v2448_v18 = vpop.f32.mrb[21].mxu1 }
 0x256   :  { %v1768_v19 = vpop.f32.mrb[22].mxu1 }
 0x257   :  { %v1771_v20 = vmax.f32 %v1766_v17, 0.0  ;;  %v2449_v21 = vpop.f32.mrb[23].mxu1 }
 0x259   :  { %v1772_v22 = vpack.c.bf16 %v1771_v20, %v1771_v20 }
 0x25b   :  { %2467 = vmatmul.mubr.bf16.vlgmr.msra.gmra.mrb[20].mxu0 %v1772_v22 }
 0x32e   :  { %v1878_v26 = vpop.f32.mrb[20].mxu0 }
 0x32f   :  { %v1879_v27 = vadd.f32 %v2173_v25, %v1878_v26  ;;  %v2468_v28 = vpop.f32.mrb[21].mxu0 }
 0x330   :  { %v1881_v29 = vpop.f32.mrb[22].mxu0 }
 0x331   :  { %v1884_v30 = vmax.f32 %v1879_v27, 0.0  ;;  %v2469_v31 = vpop.f32.mrb[23].mxu0 }
 0x333   :  { %v1885_v32 = vpack.c.bf16 %v1884_v30, %v1884_v30 }
 0x335   :  { %2487 = vmatmul.mubr.bf16.vlgmr.msra.gmra.mrb[24].mxu1 %v1885_v32 }
 0x408   :  { %v1991_v33 = vpop.f32.mrb[24].mxu1 }
 0x409   :  { %v1992_v34 = vadd.f32 %v2182_v36, %v1991_v33  ;;  %v2488_v35 = vpop.f32.mrb[25].mxu1 }
 0x40a   :  { %v1994_v37 = vpop.f32.mrb[26].mxu1 }
 0x40b   :  { %v2489_v38 = vpop.f32.mrb[27].mxu1  ;;  %v1998_v39 = vsel %vm1997_vm2, %v1992_v34, -inf }
 0x40c   :  { %1999 = vmax.xlane.f32.xlu0 %v1998_v39 }
 0x499   :  { %v2000_v40 = vpop.xlane.xlu0 %1999 }
 0x49a   :  { %v2001_v41 = vsub.f32 %v1992_v34, %v2000_v40 }
 0x49c   :  { %v2002_v42 = vmul.f32 1.442695, %v2001_v41 }
 0x49e   :  { %2663 = vpow2.f32 %v2002_v42 }
 0x4a8   :  { %v2664_v43 = vpop.eup %2663 }
 0x4a9   :  { %v2004_v44 = vsel %vm1997_vm2, %v2664_v43, 0.0 }
 0x4aa   :  { %2005 = vadd.xlane.f32.xlu0 %v2004_v44 }
 0x537   :  { %v2006_v45 = vpop.xlane.xlu0 %2005 }
 0x538   :  { %2665 = vlog2.f32 %v2006_v45 }
 0x542   :  { %v2666_v46 = vpop.eup %2665 }
 0x543   :  { %v2008_v47 = vmul.f32 0.6931472, %v2666_v46 }
 0x545   :  { %v2009_v48 = vsub.f32 %v2001_v41, %v2008_v47 }
 0x547   :  { %2010 = vst.msk [vmem:[%s3351_s9] sm:$0xff] %vm1997_vm2, %v2009_v48 }

</bundles_post_ra>
